<compile_context>
chip_gen: v6e
topology: v6e:2x2x1
jax: 0.10.0
libtpu: 0.0.40
codegen_flags: <defaults>
</compile_context>

<pallas_src>
import jax
import jax.numpy as jnp
from jax.experimental import pallas as pl
from jax.experimental.pallas import tpu as pltpu


def _band_weights(w_hwio, W):
    """(3, 3, Ci, Co) HWIO conv weights -> (3, W*Ci, W*Co) banded matrices.

    Band[ky][w_in*Ci + ci, w_out*Co + co] = w[ky, kx, ci, co] with
    w_in = w_out + kx - 1; entries outside [0, W) are zero, which implements
    the W-direction zero padding inside the matmul contraction.
    """
    _, _, Ci, Co = w_hwio.shape
    bands = []
    for ky in range(3):
        m = jnp.zeros((W * Ci, W * Co), jnp.float32)
        for kx in range(3):
            m = m + jnp.kron(jnp.eye(W, k=1 - kx, dtype=jnp.float32),
                             w_hwio[ky, kx].astype(jnp.float32))
        bands.append(m)
    return jnp.stack(bands)  # (3, W*Ci, W*Co)


def contracting_block(x_nchw, w1, b1, w2, b2):
    """Pallas ContractingBlock forward.  x_nchw: (N, Cin, H, W) float32."""
    N, Cin, H, W = x_nchw.shape
    C2 = w1.shape[-1]
    assert H % 2 == 0 and W % 2 == 0
    Hh, Wh = H // 2, W // 2
    Hp = H + 2                      # per-image rows incl. H padding
    NR = N * Hp                     # all batch images stacked on sublanes
    WCin, WC2, WhC2 = W * Cin, W * C2, Wh * C2
    f32 = jnp.float32

    # ---- lane-fused, H-padded input slab: (N*(H+2), W*Cin) ----
    x = jnp.transpose(x_nchw, (0, 2, 3, 1)).astype(f32)          # NHWC
    x = jnp.pad(x.reshape(N, H, WCin), ((0, 0), (1, 1), (0, 0)))  # H pad only
    x_fused = x.reshape(NR, WCin)

    # ---- banded conv weights + lane-tiled biases (layout plumbing, host) ----
    w1b = _band_weights(w1, W)                      # (3, W*Cin, W*C2)
    w2b = _band_weights(w2, W)                      # (3, W*C2,  W*C2)
    b1f = jnp.tile(b1.astype(f32), W).reshape(1, WC2)
    b2f = jnp.tile(b2.astype(f32), W).reshape(1, WC2)

    # ---- even/odd selection matrices for the 2x2/stride-2 max pool ----
    ri = jnp.arange(N * Hh)
    src = (ri // Hh) * Hp + 1 + 2 * (ri % Hh)       # padded row of image row 2*hh
    cols = jnp.arange(NR)
    sel_h_even = (cols[None, :] == src[:, None]).astype(f32)         # (N*Hh, NR)
    sel_h_odd = (cols[None, :] == (src + 1)[:, None]).astype(f32)
    li = jnp.arange(WC2)
    w_idx, c_idx = li // C2, li % C2
    tgt = (w_idx // 2) * C2 + c_idx
    hit = jnp.arange(WhC2)[None, :] == tgt[:, None]
    sel_w_even = (hit & (w_idx[:, None] % 2 == 0)).astype(f32)        # (W*C2, Wh*C2)
    sel_w_odd = (hit & (w_idx[:, None] % 2 == 1)).astype(f32)

    def kernel(x_ref, w1_ref, b1_ref, w2_ref, b2_ref,
               she_ref, sho_ref, swe_ref, swo_ref, o_ref):
        xv = x_ref[...]                                            # (NR, W*Cin)
        # real image rows (not the per-image H-padding rows)
        row = jax.lax.broadcasted_iota(jnp.int32, (NR, 1), 0) % Hp
        interior = jnp.logical_and(row >= 1, row <= H)

        def conv3x3(inp, wb_ref, bias):
            # ky taps = sublane shifts with zero fill; kx taps + W padding are
            # folded into the banded weights -> 3 dense MXU matmuls per conv.
            zrow = jnp.zeros((1, inp.shape[1]), jnp.float32)
            up = jnp.concatenate([zrow, inp[:-1, :]], axis=0)      # row r -> inp[r-1]
            dn = jnp.concatenate([inp[1:, :], zrow], axis=0)       # row r -> inp[r+1]
            acc = bias + jnp.dot(up, wb_ref[0], preferred_element_type=jnp.float32)
            acc = acc + jnp.dot(inp, wb_ref[1], preferred_element_type=jnp.float32)
            acc = acc + jnp.dot(dn, wb_ref[2], preferred_element_type=jnp.float32)
            return acc

        # conv1 + LeakyReLU(0.2); re-impose zero H-padding rows for conv2.
        y = conv3x3(xv, w1_ref, b1_ref[...])
        y = jnp.where(y > 0, y, 0.2 * y)
        y = jnp.where(interior, y, 0.0)

        # conv2 (LeakyReLU deferred past the pool -- it is monotone, so exact).
        z = conv3x3(y, w2_ref, b2_ref[...])                        # (NR, W*C2)

        # 2x2 / stride-2 max pool via even/odd selection matmuls + max.
        ph = jnp.maximum(
            jnp.dot(she_ref[...], z, preferred_element_type=jnp.float32),
            jnp.dot(sho_ref[...], z, preferred_element_type=jnp.float32))
        pw = jnp.maximum(
            jnp.dot(ph, swe_ref[...], preferred_element_type=jnp.float32),
            jnp.dot(ph, swo_ref[...], preferred_element_type=jnp.float32))
        pw = jnp.where(pw > 0, pw, 0.2 * pw)                       # (N*Hh, Wh*C2)

        # pack batches onto lanes -> single lane-dense (Hh, N*Wh*C2) store.
        o_ref[...] = jnp.concatenate(
            [pw[n * Hh:(n + 1) * Hh, :] for n in range(N)], axis=-1
        ).astype(o_ref.dtype)

    out_fused = pl.pallas_call(
        kernel,
        out_shape=jax.ShapeDtypeStruct((Hh, N * WhC2), f32),
        grid_spec=pltpu.PrefetchScalarGridSpec(
            num_scalar_prefetch=0,
            grid=(1,),
            in_specs=[
                pl.BlockSpec((NR, WCin), lambda g: (0, 0)),
                pl.BlockSpec((3, WCin, WC2), lambda g: (0, 0, 0)),
                pl.BlockSpec((1, WC2), lambda g: (0, 0)),
                pl.BlockSpec((3, WC2, WC2), lambda g: (0, 0, 0)),
                pl.BlockSpec((1, WC2), lambda g: (0, 0)),
                pl.BlockSpec((N * Hh, NR), lambda g: (0, 0)),
                pl.BlockSpec((N * Hh, NR), lambda g: (0, 0)),
                pl.BlockSpec((WC2, WhC2), lambda g: (0, 0)),
                pl.BlockSpec((WC2, WhC2), lambda g: (0, 0)),
            ],
            out_specs=pl.BlockSpec((Hh, N * WhC2), lambda g: (0, 0)),
        ),
        compiler_params=pltpu.CompilerParams(
            dimension_semantics=("arbitrary",)),
    )(x_fused, w1b, b1f, w2b, b2f, sel_h_even, sel_h_odd, sel_w_even, sel_w_odd)

    # (Hh, N*Wh*C2) -> (N, C2, Hh, Wh)
    out = out_fused.reshape(Hh, N, Wh, C2)
    return jnp.transpose(out, (1, 3, 0, 2))


def reference(x_nchw, w1, b1, w2, b2):
    """Pure-JAX reference mirroring the PyTorch module."""
    def conv(x, w, b):
        y = jax.lax.conv_general_dilated(
            x, w, window_strides=(1, 1), padding=((1, 1), (1, 1)),
            dimension_numbers=("NCHW", "HWIO", "NCHW"))
        return y + b.reshape(1, -1, 1, 1)

    def lrelu(v):
        return jnp.where(v > 0, v, 0.2 * v)

    y = lrelu(conv(x_nchw, w1, b1))
    z = lrelu(conv(y, w2, b2))
    return jax.lax.reduce_window(z, -jnp.inf, jax.lax.max,
                                 (1, 1, 2, 2), (1, 1, 2, 2), "VALID")


if __name__ == "__main__":
    # Module config: input_channels=4 -> hidden channels = 8
    N, Cin, H, W = 2, 4, 16, 16
    C2 = Cin * 2

    key = jax.random.PRNGKey(0)
    k_x, k_w1, k_b1, k_w2, k_b2 = jax.random.split(key, 5)

    x = jax.random.normal(k_x, (N, Cin, H, W), dtype=jnp.float32)

    # PyTorch-default-style uniform(-1/sqrt(fan_in), 1/sqrt(fan_in)) init,
    # stored directly in HWIO layout.
    lim1 = 1.0 / jnp.sqrt(jnp.float32(Cin * 3 * 3))
    w1 = jax.random.uniform(k_w1, (3, 3, Cin, C2), jnp.float32, -lim1, lim1)
    b1 = jax.random.uniform(k_b1, (C2,), jnp.float32, -lim1, lim1)
    lim2 = 1.0 / jnp.sqrt(jnp.float32(C2 * 3 * 3))
    w2 = jax.random.uniform(k_w2, (3, 3, C2, C2), jnp.float32, -lim2, lim2)
    b2 = jax.random.uniform(k_b2, (C2,), jnp.float32, -lim2, lim2)

    out = jax.block_until_ready(contracting_block(x, w1, b1, w2, b2))
    ref = jax.block_until_ready(reference(x, w1, b1, w2, b2))

    assert out.shape == (N, C2, H // 2, W // 2), out.shape
    assert jnp.allclose(out, ref, rtol=1e-4, atol=1e-4), \
        float(jnp.max(jnp.abs(out - ref)))

    print("KERNEL_OK")
</pallas_src>

<mosaic_0001>
module attributes {stable_mosaic.version = 11 : i64} {
  func.func @kernel(%arg0: i32, %arg1: memref<36x64xf32, #tpu.memory_space<vmem>>, %arg2: memref<3x64x128xf32, #tpu.memory_space<vmem>>, %arg3: memref<1x128xf32, #tpu.memory_space<vmem>>, %arg4: memref<3x128x128xf32, #tpu.memory_space<vmem>>, %arg5: memref<1x128xf32, #tpu.memory_space<vmem>>, %arg6: memref<16x36xf32, #tpu.memory_space<vmem>>, %arg7: memref<16x36xf32, #tpu.memory_space<vmem>>, %arg8: memref<128x64xf32, #tpu.memory_space<vmem>>, %arg9: memref<128x64xf32, #tpu.memory_space<vmem>>, %arg10: memref<8x128xf32, #tpu.memory_space<vmem>>) attributes {dimension_semantics = [#tpu.dimension_semantics<arbitrary>], iteration_bounds = array<i64: 1>, scalar_prefetch = 0 : i64, scratch_operands = 0 : i64, tpu.core_type = #tpu.core_type<tc>, window_params = [{pipeline_mode = #tpu.pipeline_mode<synchronous>, transform_indices = @transform_0, window_bounds = array<i64: 36, 64>}, {pipeline_mode = #tpu.pipeline_mode<synchronous>, transform_indices = @transform_1, window_bounds = array<i64: 3, 64, 128>}, {pipeline_mode = #tpu.pipeline_mode<synchronous>, transform_indices = @transform_2, window_bounds = array<i64: 1, 128>}, {pipeline_mode = #tpu.pipeline_mode<synchronous>, transform_indices = @transform_3, window_bounds = array<i64: 3, 128, 128>}, {pipeline_mode = #tpu.pipeline_mode<synchronous>, transform_indices = @transform_4, window_bounds = array<i64: 1, 128>}, {pipeline_mode = #tpu.pipeline_mode<synchronous>, transform_indices = @transform_5, window_bounds = array<i64: 16, 36>}, {pipeline_mode = #tpu.pipeline_mode<synchronous>, transform_indices = @transform_6, window_bounds = array<i64: 16, 36>}, {pipeline_mode = #tpu.pipeline_mode<synchronous>, transform_indices = @transform_7, window_bounds = array<i64: 128, 64>}, {pipeline_mode = #tpu.pipeline_mode<synchronous>, transform_indices = @transform_8, window_bounds = array<i64: 128, 64>}, {pipeline_mode = #tpu.pipeline_mode<synchronous>, transform_indices = @transform_9, window_bounds = array<i64: 8, 128>}]} {
    %c0 = arith.constant 0 : index
    %c0_0 = arith.constant 0 : index
    %0 = vector.load %arg1[%c0, %c0_0] : memref<36x64xf32, #tpu.memory_space<vmem>>, vector<36x64xf32>
    %1 = tpu.iota {dimensions = array<i32: 0>} : vector<36x1xi32>
    %c18_i32 = arith.constant 18 : i32
    %c0_i32 = arith.constant 0 : i32
    %2 = arith.cmpi eq, %c18_i32, %c0_i32 : i32
    %c1_i32 = arith.constant 1 : i32
    %3 = arith.select %2, %c1_i32, %c18_i32 : i32
    %4 = vector.broadcast %3 : i32 to vector<36x1xi32>
    %5 = arith.remsi %1, %4 : vector<36x1xi32>
    %c0_i32_1 = arith.constant 0 : i32
    %6 = vector.broadcast %c0_i32_1 : i32 to vector<36x1xi32>
    %7 = arith.cmpi ne, %5, %6 : vector<36x1xi32>
    %c0_i32_2 = arith.constant 0 : i32
    %8 = vector.broadcast %c0_i32_2 : i32 to vector<36x1xi32>
    %9 = arith.cmpi slt, %5, %8 : vector<36x1xi32>
    %c0_i32_3 = arith.constant 0 : i32
    %10 = arith.cmpi slt, %3, %c0_i32_3 : i32
    %11 = vector.broadcast %10 : i1 to vector<36x1xi1>
    %12 = vector.broadcast %11 : vector<36x1xi1> to vector<36x1xi1>
    %13 = arith.xori %9, %12 : vector<36x1xi1>
    %14 = arith.andi %13, %7 : vector<36x1xi1>
    %15 = vector.broadcast %3 : i32 to vector<36x1xi32>
    %16 = arith.addi %5, %15 : vector<36x1xi32>
    %17 = arith.select %14, %16, %5 : vector<36x1xi1>, vector<36x1xi32>
    %c1_i32_4 = arith.constant 1 : i32
    %18 = vector.broadcast %c1_i32_4 : i32 to vector<36x1xi32>
    %19 = arith.cmpi sge, %17, %18 : vector<36x1xi32>
    %c16_i32 = arith.constant 16 : i32
    %20 = vector.broadcast %c16_i32 : i32 to vector<36x1xi32>
    %21 = arith.cmpi sle, %17, %20 : vector<36x1xi32>
    %22 = arith.andi %19, %21 : vector<36x1xi1>
    %c0_5 = arith.constant 0 : index
    %c0_6 = arith.constant 0 : index
    %23 = vector.load %arg3[%c0_5, %c0_6] : memref<1x128xf32, #tpu.memory_space<vmem>>, vector<1x128xf32>
    %cst = arith.constant 0.000000e+00 : f32
    %24 = vector.broadcast %cst : f32 to vector<1x64xf32>
    %25 = vector.extract_strided_slice %0 {offsets = [0, 0], sizes = [35, 64], strides = [1, 1]} : vector<36x64xf32> to vector<35x64xf32>
    %26 = tpu.concatenate %24, %25 in 0 : vector<1x64xf32>, vector<35x64xf32> -> vector<36x64xf32>
    %27 = vector.extract_strided_slice %0 {offsets = [1, 0], sizes = [35, 64], strides = [1, 1]} : vector<36x64xf32> to vector<35x64xf32>
    %28 = tpu.concatenate %27, %24 in 0 : vector<35x64xf32>, vector<1x64xf32> -> vector<36x64xf32>
    %c0_7 = arith.constant 0 : index
    %c0_8 = arith.constant 0 : index
    %c0_9 = arith.constant 0 : index
    %29 = vector.load %arg2[%c0_7, %c0_8, %c0_9] : memref<3x64x128xf32, #tpu.memory_space<vmem>>, vector<1x64x128xf32>
    %30 = vector.shape_cast %29 : vector<1x64x128xf32> to vector<64x128xf32>
    %cst_10 = arith.constant dense<0.000000e+00> : vector<36x128xf32>
    %31 = tpu.matmul %26, %30, %cst_10 {dimension_numbers = #tpu.dot_dimension_numbers<[1], [0], [0], [1], [0, 0, 1, 1], [], []>} : vector<36x64xf32>, vector<64x128xf32>, vector<36x128xf32> -> vector<36x128xf32>
    %32 = vector.broadcast %23 : vector<1x128xf32> to vector<36x128xf32>
    %33 = arith.addf %32, %31 : vector<36x128xf32>
    %c1 = arith.constant 1 : index
    %c0_11 = arith.constant 0 : index
    %c0_12 = arith.constant 0 : index
    %34 = vector.load %arg2[%c1, %c0_11, %c0_12] : memref<3x64x128xf32, #tpu.memory_space<vmem>>, vector<1x64x128xf32>
    %35 = vector.shape_cast %34 : vector<1x64x128xf32> to vector<64x128xf32>
    %cst_13 = arith.constant dense<0.000000e+00> : vector<36x128xf32>
    %36 = tpu.matmul %0, %35, %cst_13 {dimension_numbers = #tpu.dot_dimension_numbers<[1], [0], [0], [1], [0, 0, 1, 1], [], []>} : vector<36x64xf32>, vector<64x128xf32>, vector<36x128xf32> -> vector<36x128xf32>
    %37 = arith.addf %33, %36 : vector<36x128xf32>
    %c2 = arith.constant 2 : index
    %c0_14 = arith.constant 0 : index
    %c0_15 = arith.constant 0 : index
    %38 = vector.load %arg2[%c2, %c0_14, %c0_15] : memref<3x64x128xf32, #tpu.memory_space<vmem>>, vector<1x64x128xf32>
    %39 = vector.shape_cast %38 : vector<1x64x128xf32> to vector<64x128xf32>
    %cst_16 = arith.constant dense<0.000000e+00> : vector<36x128xf32>
    %40 = tpu.matmul %28, %39, %cst_16 {dimension_numbers = #tpu.dot_dimension_numbers<[1], [0], [0], [1], [0, 0, 1, 1], [], []>} : vector<36x64xf32>, vector<64x128xf32>, vector<36x128xf32> -> vector<36x128xf32>
    %41 = arith.addf %37, %40 : vector<36x128xf32>
    %cst_17 = arith.constant 0.000000e+00 : f32
    %42 = vector.broadcast %cst_17 : f32 to vector<36x128xf32>
    %43 = arith.cmpf ogt, %41, %42 : vector<36x128xf32>
    %cst_18 = arith.constant 2.000000e-01 : f32
    %44 = vector.broadcast %cst_18 : f32 to vector<36x128xf32>
    %45 = arith.mulf %44, %41 : vector<36x128xf32>
    %46 = arith.select %43, %41, %45 : vector<36x128xi1>, vector<36x128xf32>
    %cst_19 = arith.constant 0.000000e+00 : f32
    %47 = vector.shape_cast %22 : vector<36x1xi1> to vector<36x1xi1>
    %48 = vector.broadcast %47 : vector<36x1xi1> to vector<36x128xi1>
    %49 = vector.broadcast %cst_19 : f32 to vector<36x128xf32>
    %50 = arith.select %48, %46, %49 : vector<36x128xi1>, vector<36x128xf32>
    %c0_20 = arith.constant 0 : index
    %c0_21 = arith.constant 0 : index
    %51 = vector.load %arg5[%c0_20, %c0_21] : memref<1x128xf32, #tpu.memory_space<vmem>>, vector<1x128xf32>
    %cst_22 = arith.constant 0.000000e+00 : f32
    %52 = vector.broadcast %cst_22 : f32 to vector<1x128xf32>
    %53 = vector.extract_strided_slice %50 {offsets = [0, 0], sizes = [35, 128], strides = [1, 1]} : vector<36x128xf32> to vector<35x128xf32>
    %54 = tpu.concatenate %52, %53 in 0 : vector<1x128xf32>, vector<35x128xf32> -> vector<36x128xf32>
    %55 = vector.extract_strided_slice %50 {offsets = [1, 0], sizes = [35, 128], strides = [1, 1]} : vector<36x128xf32> to vector<35x128xf32>
    %56 = tpu.concatenate %55, %52 in 0 : vector<35x128xf32>, vector<1x128xf32> -> vector<36x128xf32>
    %c0_23 = arith.constant 0 : index
    %c0_24 = arith.constant 0 : index
    %c0_25 = arith.constant 0 : index
    %57 = vector.load %arg4[%c0_23, %c0_24, %c0_25] : memref<3x128x128xf32, #tpu.memory_space<vmem>>, vector<1x128x128xf32>
    %58 = vector.shape_cast %57 : vector<1x128x128xf32> to vector<128x128xf32>
    %cst_26 = arith.constant dense<0.000000e+00> : vector<36x128xf32>
    %59 = tpu.matmul %54, %58, %cst_26 {dimension_numbers = #tpu.dot_dimension_numbers<[1], [0], [0], [1], [0, 0, 1, 1], [], []>} : vector<36x128xf32>, vector<128x128xf32>, vector<36x128xf32> -> vector<36x128xf32>
    %60 = vector.broadcast %51 : vector<1x128xf32> to vector<36x128xf32>
    %61 = arith.addf %60, %59 : vector<36x128xf32>
    %c1_27 = arith.constant 1 : index
    %c0_28 = arith.constant 0 : index
    %c0_29 = arith.constant 0 : index
    %62 = vector.load %arg4[%c1_27, %c0_28, %c0_29] : memref<3x128x128xf32, #tpu.memory_space<vmem>>, vector<1x128x128xf32>
    %63 = vector.shape_cast %62 : vector<1x128x128xf32> to vector<128x128xf32>
    %cst_30 = arith.constant dense<0.000000e+00> : vector<36x128xf32>
    %64 = tpu.matmul %50, %63, %cst_30 {dimension_numbers = #tpu.dot_dimension_numbers<[1], [0], [0], [1], [0, 0, 1, 1], [], []>} : vector<36x128xf32>, vector<128x128xf32>, vector<36x128xf32> -> vector<36x128xf32>
    %65 = arith.addf %61, %64 : vector<36x128xf32>
    %c2_31 = arith.constant 2 : index
    %c0_32 = arith.constant 0 : index
    %c0_33 = arith.constant 0 : index
    %66 = vector.load %arg4[%c2_31, %c0_32, %c0_33] : memref<3x128x128xf32, #tpu.memory_space<vmem>>, vector<1x128x128xf32>
    %67 = vector.shape_cast %66 : vector<1x128x128xf32> to vector<128x128xf32>
    %cst_34 = arith.constant dense<0.000000e+00> : vector<36x128xf32>
    %68 = tpu.matmul %56, %67, %cst_34 {dimension_numbers = #tpu.dot_dimension_numbers<[1], [0], [0], [1], [0, 0, 1, 1], [], []>} : vector<36x128xf32>, vector<128x128xf32>, vector<36x128xf32> -> vector<36x128xf32>
    %69 = arith.addf %65, %68 : vector<36x128xf32>
    %c0_35 = arith.constant 0 : index
    %c0_36 = arith.constant 0 : index
    %70 = vector.load %arg6[%c0_35, %c0_36] : memref<16x36xf32, #tpu.memory_space<vmem>>, vector<16x36xf32>
    %cst_37 = arith.constant dense<0.000000e+00> : vector<16x128xf32>
    %71 = tpu.matmul %70, %69, %cst_37 {dimension_numbers = #tpu.dot_dimension_numbers<[1], [0], [0], [1], [0, 0, 1, 1], [], []>} : vector<16x36xf32>, vector<36x128xf32>, vector<16x128xf32> -> vector<16x128xf32>
    %c0_38 = arith.constant 0 : index
    %c0_39 = arith.constant 0 : index
    %72 = vector.load %arg7[%c0_38, %c0_39] : memref<16x36xf32, #tpu.memory_space<vmem>>, vector<16x36xf32>
    %cst_40 = arith.constant dense<0.000000e+00> : vector<16x128xf32>
    %73 = tpu.matmul %72, %69, %cst_40 {dimension_numbers = #tpu.dot_dimension_numbers<[1], [0], [0], [1], [0, 0, 1, 1], [], []>} : vector<16x36xf32>, vector<36x128xf32>, vector<16x128xf32> -> vector<16x128xf32>
    %74 = arith.maximumf %71, %73 : vector<16x128xf32>
    %c0_41 = arith.constant 0 : index
    %c0_42 = arith.constant 0 : index
    %75 = vector.load %arg8[%c0_41, %c0_42] : memref<128x64xf32, #tpu.memory_space<vmem>>, vector<128x64xf32>
    %cst_43 = arith.constant dense<0.000000e+00> : vector<16x64xf32>
    %76 = tpu.matmul %74, %75, %cst_43 {dimension_numbers = #tpu.dot_dimension_numbers<[1], [0], [0], [1], [0, 0, 1, 1], [], []>} : vector<16x128xf32>, vector<128x64xf32>, vector<16x64xf32> -> vector<16x64xf32>
    %c0_44 = arith.constant 0 : index
    %c0_45 = arith.constant 0 : index
    %77 = vector.load %arg9[%c0_44, %c0_45] : memref<128x64xf32, #tpu.memory_space<vmem>>, vector<128x64xf32>
    %cst_46 = arith.constant dense<0.000000e+00> : vector<16x64xf32>
    %78 = tpu.matmul %74, %77, %cst_46 {dimension_numbers = #tpu.dot_dimension_numbers<[1], [0], [0], [1], [0, 0, 1, 1], [], []>} : vector<16x128xf32>, vector<128x64xf32>, vector<16x64xf32> -> vector<16x64xf32>
    %79 = arith.maximumf %76, %78 : vector<16x64xf32>
    %cst_47 = arith.constant 0.000000e+00 : f32
    %80 = vector.broadcast %cst_47 : f32 to vector<16x64xf32>
    %81 = arith.cmpf ogt, %79, %80 : vector<16x64xf32>
    %cst_48 = arith.constant 2.000000e-01 : f32
    %82 = vector.broadcast %cst_48 : f32 to vector<16x64xf32>
    %83 = arith.mulf %82, %79 : vector<16x64xf32>
    %84 = arith.select %81, %79, %83 : vector<16x64xi1>, vector<16x64xf32>
    %85 = vector.extract_strided_slice %84 {offsets = [0, 0], sizes = [8, 64], strides = [1, 1]} : vector<16x64xf32> to vector<8x64xf32>
    %86 = vector.extract_strided_slice %84 {offsets = [8, 0], sizes = [8, 64], strides = [1, 1]} : vector<16x64xf32> to vector<8x64xf32>
    %87 = tpu.concatenate %85, %86 in 1 : vector<8x64xf32>, vector<8x64xf32> -> vector<8x128xf32>
    %c0_49 = arith.constant 0 : index
    %c0_50 = arith.constant 0 : index
    %88 = vector.load %arg10[%c0_49, %c0_50] : memref<8x128xf32, #tpu.memory_space<vmem>>, vector<8x128xf32>
    tpu.vector_store %arg10[%c0_49, %c0_50], %87 {strides = array<i32>} : memref<8x128xf32, #tpu.memory_space<vmem>>, vector<8x128xf32>,
    return
  }
  func.func @transform_0(%arg0: i32) -> (i32, i32) {
    %c0_i32 = arith.constant 0 : i32
    %c0_i32_0 = arith.constant 0 : i32
    %c0_i32_1 = arith.constant 0 : i32
    return %c0_i32, %c0_i32_0 : i32, i32
  }
  func.func @transform_1(%arg0: i32) -> (i32, i32, i32) {
    %c0_i32 = arith.constant 0 : i32
    %c0_i32_0 = arith.constant 0 : i32
    %c0_i32_1 = arith.constant 0 : i32
    %c0_i32_2 = arith.constant 0 : i32
    return %c0_i32, %c0_i32_0, %c0_i32_1 : i32, i32, i32
  }
  func.func @transform_2(%arg0: i32) -> (i32, i32) {
    %c0_i32 = arith.constant 0 : i32
    %c0_i32_0 = arith.constant 0 : i32
    %c0_i32_1 = arith.constant 0 : i32
    return %c0_i32, %c0_i32_0 : i32, i32
  }
  func.func @transform_3(%arg0: i32) -> (i32, i32, i32) {
    %c0_i32 = arith.constant 0 : i32
    %c0_i32_0 = arith.constant 0 : i32
    %c0_i32_1 = arith.constant 0 : i32
    %c0_i32_2 = arith.constant 0 : i32
    return %c0_i32, %c0_i32_0, %c0_i32_1 : i32, i32, i32
  }
  func.func @transform_4(%arg0: i32) -> (i32, i32) {
    %c0_i32 = arith.constant 0 : i32
    %c0_i32_0 = arith.constant 0 : i32
    %c0_i32_1 = arith.constant 0 : i32
    return %c0_i32, %c0_i32_0 : i32, i32
  }
  func.func @transform_5(%arg0: i32) -> (i32, i32) {
    %c0_i32 = arith.constant 0 : i32
    %c0_i32_0 = arith.constant 0 : i32
    %c0_i32_1 = arith.constant 0 : i32
    return %c0_i32, %c0_i32_0 : i32, i32
  }
  func.func @transform_6(%arg0: i32) -> (i32, i32) {
    %c0_i32 = arith.constant 0 : i32
    %c0_i32_0 = arith.constant 0 : i32
    %c0_i32_1 = arith.constant 0 : i32
    return %c0_i32, %c0_i32_0 : i32, i32
  }
  func.func @transform_7(%arg0: i32) -> (i32, i32) {
    %c0_i32 = arith.constant 0 : i32
    %c0_i32_0 = arith.constant 0 : i32
    %c0_i32_1 = arith.constant 0 : i32
    return %c0_i32, %c0_i32_0 : i32, i32
  }
  func.func @transform_8(%arg0: i32) -> (i32, i32) {
    %c0_i32 = arith.constant 0 : i32
    %c0_i32_0 = arith.constant 0 : i32
    %c0_i32_1 = arith.constant 0 : i32
    return %c0_i32, %c0_i32_0 : i32, i32
  }
  func.func @transform_9(%arg0: i32) -> (i32, i32) {
    %c0_i32 = arith.constant 0 : i32
    %c0_i32_0 = arith.constant 0 : i32
    %c0_i32_1 = arith.constant 0 : i32
    return %c0_i32, %c0_i32_0 : i32, i32
  }
}

</mosaic_0001>

<bundles_post_ra>
// kernel: tpu_custom_call.1
= control target key start
LH: loop header
LB: loop body
LE: loop exit
PB: predicated region body
PF: predicated region fallthrough
CT: control target
= control target key end

     0   :  { %14 = vsyncpa [#allocation3], 0  ;;  %s2724_s0 = inlined_call_operand.hbm [shape: f32[36,64], index: 0, kind: input, shape index: {}]   ;;  %s2725_s1 = inlined_call_operand.hbm [shape: f32[3,64,128], index: 1, kind: input, shape index: {}]   ;;  %s2726_s2 = inlined_call_operand.vmem [shape: f32[1,128], index: 2, kind: input, shape index: {}]   ;;  %s2727_s3 = inlined_call_operand.vmem [shape: f32[3,128,128], index: 3, kind: input, shape index: {}]   ;;  %s2728_s4 = inlined_call_operand.vmem [shape: f32[1,128], index: 4, kind: input, shape index: {}]   ;;  %s2729_s5 = inlined_call_operand.hbm [shape: f32[16,36], index: 5, kind: input, shape index: {}]   ;;  %s2730_s6 = inlined_call_operand.hbm [shape: f32[16,36], index: 6, kind: input, shape index: {}]   ;;  %s2731_s7 = inlined_call_operand.vmem [shape: f32[128,64], index: 7, kind: input, shape index: {}]   ;;  %s2732_s8 = inlined_call_operand.vmem [shape: f32[128,64], index: 8, kind: input, shape index: {}]   ;;  %s2733_s9 = inlined_call_operand.hbm [shape: f32[8,128], index: 9, kind: output, shape index: {}]  }
   0x1   :  { %15 = vsyncpa [#allocation6], 0 }
   0x2   :  { %16 = vsyncpa [#allocation9], 0 }
   0x3   :  { %17 = vsyncpa [#allocation4], 0  ;;  %s2057_s30 = smov [#allocation5]   ;;  %s2058_s11 = smov [#allocation2]  }
   0x4   :  { %s35_s10 = sshll.u32 %s2057_s30, 4  ;;  %s23_s12 = sshll.u32 %s2058_s11, 4  ;;  %s36_s10 = int_to_ptr.vmem [resolvable:$true] %s35_s10  ;;  %s24_s12 = int_to_ptr.vmem [resolvable:$true] %s23_s12 }
   0x5   :  { %s1957_s13 = scalar_lea.vmem %s36_s10, 3072  ;;  %p1962_p1 = scmp.lt.s32.totalorder %s36_s10, %s36_s10 }
   0x6   :  { %p1958_p0 = scmp.ne.s32.totalorder %s36_s10, %s1957_s13  ;;  %p1963_p2 = scmp.lt.s32.totalorder %s1957_s13, %s1957_s13 }
   0x8   :  { %p1964_p3 = por %p1963_p2, %p1962_p1 }
   0xa   :  { %p1965_p4 = pnand %p1964_p3, %p1958_p0 }
   0xc   :  { %1968 = shalt.err (!%p1965_p4)
}
   0xd   :  { %s2059_s14 = smov 128   ;;  %s2060_s15 = smov 8  }
   0xe   :  { %41 = dma.hbm_to_vmem [thread:$0]  %s2725_s1, 3072, %s36_s10, [#allocation6], %s2059_s14, %s2059_s14, %s2060_s15  }
   0xf   :  { %s1977_s18 = scalar_lea.vmem %s24_s12, 640  ;;  %p1982_p6 = scmp.lt.s32.totalorder %s24_s12, %s24_s12 }
  0x10   :  { %p1978_p5 = scmp.ne.s32.totalorder %s24_s12, %s1977_s18  ;;  %p1983_p7 = scmp.lt.s32.totalorder %s1977_s18, %s1977_s18 }
  0x12   :  { %p1984_p8 = por %p1983_p7, %p1982_p6 }
  0x14   :  { %p1985_p9 = pnand %p1984_p8, %p1978_p5 }
  0x16   :  { %1988 = shalt.err (!%p1985_p9)
}
  0x17   :  { %29 = dma.hbm_to_vmem [thread:$0]  %s2724_s0, 640, %s24_s12, [#allocation3], %s2059_s14, %s2059_s14, %s2060_s15  }
  0x18   :  { %s2061_s21 = smov [#allocation7]   ;;  %s2062_s23 = smov [#allocation8]  }
  0x19   :  { %s53_s22 = sshll.u32 %s2061_s21, 4  ;;  %s65_s24 = sshll.u32 %s2062_s23, 4  ;;  %s54_s22 = int_to_ptr.vmem [resolvable:$true] %s53_s22  ;;  %s66_s24 = int_to_ptr.vmem [resolvable:$true] %s65_s24 }
  0x1a   :  { %s1997_s1 = scalar_lea.vmem %s54_s22, 256  ;;  %p2002_p11 = scmp.lt.s32.totalorder %s54_s22, %s54_s22 }
  0x1b   :  { %p1998_p10 = scmp.ne.s32.totalorder %s54_s22, %s1997_s1  ;;  %p2003_p12 = scmp.lt.s32.totalorder %s1997_s1, %s1997_s1 }
  0x1d   :  { %p2004_p13 = por %p2003_p12, %p2002_p11 }
  0x1f   :  { %p2005_p0 = pnand %p2004_p13, %p1998_p10 }
  0x21   :  { %2008 = shalt.err (!%p2005_p0)
}
  0x22   :  { %59 = dma.hbm_to_vmem [thread:$0]  %s2729_s5, 256, %s54_s22, [#allocation6], %s2059_s14, %s2059_s14, %s2060_s15  }
  0x23   :  { %s2017_s0 = scalar_lea.vmem %s66_s24, 256  ;;  %p2022_p2 = scmp.lt.s32.totalorder %s66_s24, %s66_s24 }
  0x24   :  { %p2018_p1 = scmp.ne.s32.totalorder %s66_s24, %s2017_s0  ;;  %p2023_p3 = scmp.lt.s32.totalorder %s2017_s0, %s2017_s0 }
  0x26   :  { %p2024_p4 = por %p2023_p3, %p2022_p2 }
  0x28   :  { %p2025_p5 = pnand %p2024_p4, %p2018_p1 }
  0x2a   :  { %2028 = shalt.err (!%p2025_p5)
}
  0x2b   :  { %71 = dma.hbm_to_vmem [thread:$0]  %s2730_s6, 256, %s66_s24, [#allocation9], %s2059_s14, %s2059_s14, %s2060_s15  }
  0x2c   :  { %2049 = dma.done.wait [#allocation3], 640  }
  0x2d   :  { %2050 = vsyncadd [#allocation3], 4294966656 }
  0x2e   :  { %2051 = dma.done.wait [#allocation6], 3328  }
  0x2f   :  { %2052 = vsyncadd [#allocation6], 4294963968 }
  0x30   :  { %2053 = dma.done.wait [#allocation9], 256  }
  0x31   :  { %2054 = vsyncadd [#allocation9], 4294967040  ;;  %v2063_v0 = vmov 0.0   ;;  %vm2064_vm0 = vmmov 0   ;;  %v232_v1 = vld [vmem:[#allocation5 + $0x38] sm:$0xff]  ;;  %v231_v2 = vld [vmem:[#allocation5 + $0x30] sm:$0xff] }
  0x32   :  { %1583 = vmatprep.subr.mxu0 %v2063_v0  ;;  %1913 = vmatprep.subr.mxu1 %v2063_v0  ;;  %v230_v3 = vld [vmem:[#allocation5 + $0x28] sm:$0xff]  ;;  %v229_v4 = vld [vmem:[#allocation5 + $0x20] sm:$0xff]  ;;  %v228_v5 = vld [vmem:[#allocation5 + $0x18] sm:$0xff]  ;;  %vm200_vm1 = vcmask 1040384   ;;  %vm2734_vm2 = vcmask 523264   ;;  %vm212_vm3 = vcmask 1046528  }
  0x33   :  { %1599 = vmatprep.mubr.msk.f32.mxu0 %vm2064_vm0, %v2063_v0  ;;  %1611 = vmatprep.mubr.msk.f32.mxu1 %vm2064_vm0, %v2063_v0  ;;  %v2153_v6 = vld [vmem:[#allocation2] sm:$0xff]  ;;  %v2155_v7 = vld [vmem:[#allocation2 + $0x18] sm:$0xff]  ;;  %v226_v13 = vld [vmem:[#allocation5 + $0x8] sm:$0xff]  ;;  %vm223_vm4 = vcmask 1042432  }
  0x34   :  { %1584 = vmatpush3.msra.mxu0 %v232_v1  ;;  %1921 = vmatpush3.msra.mxu1 %v232_v1  ;;  %v2157_v8 = vld [vmem:[#allocation2 + $0x20] sm:$0xf]  ;;  %v227_v9 = vld [vmem:[#allocation5 + $0x10] sm:$0xff]  ;;  %v201_v10 = vrot.slane %v2153_v6, 7  ;;  %v206_v11 = vrot.slane %v2155_v7, 7  ;;  %v225_v14 = vld [vmem:[#allocation5] sm:$0xff] }
  0x35   :  { %1585 = vmatprep.subr.mxu0 %v2063_v0  ;;  %1914 = vmatprep.subr.mxu1 %v2063_v0  ;;  %v208_v12 = vrot.slane %v2157_v8, 7  ;;  %v2168_v15 = vld [vmem:[#allocation2 + $0x8] sm:$0xff]  ;;  %v354_v18 = vld [vmem:[#allocation5 + $0x78] sm:$0xff]  ;;  %v353_v21 = vld [vmem:[#allocation5 + $0x70] sm:$0xff]  ;;  %v213_v36 = vrot.slane %v2153_v6, 1  ;;  %v218_v47 = vrot.slane %v2155_v7, 1 }
  0x36   :  { %1586 = vmatpush3.msra.mxu0 %v231_v2  ;;  %1922 = vmatpush3.msra.mxu1 %v231_v2  ;;  %v211_v16 = vsel %vm200_vm1, 0.0, %v201_v10  ;;  %v468_v19 = vld [vmem:[#allocation5 + $0xb8] sm:$0xff]  ;;  %v202_v20 = vrot.slane %v2168_v15, 7  ;;  %v2181_v22 = vld [vmem:[#allocation2 + $0x10] sm:$0xff]  ;;  %v467_v23 = vld [vmem:[#allocation5 + $0xb0] sm:$0xff]  ;;  %v214_v37 = vrot.slane %v2168_v15, 1 }
  0x37   :  { %1587 = vmatprep.subr.mxu0 %v2063_v0  ;;  %1915 = vmatprep.subr.mxu1 %v2063_v0  ;;  %v209_v17 = vsel %vm200_vm1, %v206_v11, %v208_v12  ;;  %v352_v25 = vld [vmem:[#allocation5 + $0x68] sm:$0xff]  ;;  %v204_v27 = vrot.slane %v2181_v22, 7  ;;  %v351_v28 = vld [vmem:[#allocation5 + $0x60] sm:$0xff]  ;;  %v350_v31 = vld [vmem:[#allocation5 + $0x58] sm:$0xff]  ;;  %v216_v43 = vrot.slane %v2181_v22, 1  ;;  %v220_v51 = vrot.slane %v2157_v8, 1 }
  0x38   :  { %1588 = vmatpush3.msra.mxu0 %v230_v3  ;;  %1923 = vmatpush3.msra.mxu1 %v230_v3  ;;  %v203_v24 = vsel %vm200_vm1, %v201_v10, %v202_v20  ;;  %v466_v26 = vld [vmem:[#allocation5 + $0xa8] sm:$0xff]  ;;  %v465_v29 = vld [vmem:[#allocation5 + $0xa0] sm:$0xff]  ;;  %v464_v32 = vld [vmem:[#allocation5 + $0x98] sm:$0xff]  ;;  %v215_v42 = vsel %vm212_vm3, %v213_v36, %v214_v37 }
  0x39   :  { %1589 = vmatprep.subr.mxu0 %v2063_v0  ;;  %1916 = vmatprep.subr.mxu1 %v2063_v0  ;;  %v205_v30 = vsel %vm200_vm1, %v202_v20, %v204_v27  ;;  %v349_v33 = vld [vmem:[#allocation5 + $0x50] sm:$0xff]  ;;  %v207_v35 = vsel %vm200_vm1, %v204_v27, %v206_v11  ;;  %v348_v38 = vld [vmem:[#allocation5 + $0x48] sm:$0xff]  ;;  %v347_v40 = vld [vmem:[#allocation5 + $0x40] sm:$0xff]  ;;  %v217_v46 = vsel %vm212_vm3, %v214_v37, %v216_v43  ;;  %v224_v56 = vsel %vm223_vm4, %v220_v51, 0.0 }
  0x3a   :  { %1590 = vmatpush3.msra.mxu0 %v229_v4  ;;  %1924 = vmatpush3.msra.mxu1 %v229_v4  ;;  %v463_v34 = vld [vmem:[#allocation5 + $0x90] sm:$0xff]  ;;  %v462_v39 = vld [vmem:[#allocation5 + $0x88] sm:$0xff]  ;;  %v461_v41 = vld [vmem:[#allocation5 + $0x80] sm:$0xff]  ;;  %v219_v50 = vsel %vm212_vm3, %v216_v43, %v218_v47  ;;  %v221_v54 = vsel %vm212_vm3, %v218_v47, %v220_v51 }
  0x3b   :  { %1591 = vmatprep.subr.mxu0 %v2063_v0  ;;  %1917 = vmatprep.subr.mxu1 %v2063_v0  ;;  %v1402_v44 = vld [vmem:[%s2727_s3 + $0xf8] sm:$0xff]  ;;  %v1401_v48 = vld [vmem:[%s2727_s3 + $0xf0] sm:$0xff]  ;;  %v1400_v52 = vld [vmem:[%s2727_s3 + $0xe8] sm:$0xff] }
  0x3c   :  { %1592 = vmatpush3.msra.mxu0 %v228_v5  ;;  %1925 = vmatpush3.msra.mxu1 %v228_v5  ;;  %v656_v45 = vld [vmem:[%s2727_s3 + $0x78] sm:$0xff]  ;;  %v655_v49 = vld [vmem:[%s2727_s3 + $0x70] sm:$0xff]  ;;  %v654_v53 = vld [vmem:[%s2727_s3 + $0x68] sm:$0xff] }
  0x3d   :  { %1593 = vmatprep.subr.mxu0 %v2063_v0  ;;  %1918 = vmatprep.subr.mxu1 %v2063_v0  ;;  %v1399_v55 = vld [vmem:[%s2727_s3 + $0xe0] sm:$0xff]  ;;  %v1398_v58 = vld [vmem:[%s2727_s3 + $0xd8] sm:$0xff]  ;;  %v1397_v60 = vld [vmem:[%s2727_s3 + $0xd0] sm:$0xff] }
  0x3e   :  { %1594 = vmatpush3.msra.mxu0 %v227_v9  ;;  %1926 = vmatpush3.msra.mxu1 %v227_v9  ;;  %v653_v57 = vld [vmem:[%s2727_s3 + $0x60] sm:$0xff]  ;;  %v652_v59 = vld [vmem:[%s2727_s3 + $0x58] sm:$0xff]  ;;  %v651_v61 = vld [vmem:[%s2727_s3 + $0x50] sm:$0xff] }
  0x3f   :  { %1595 = vmatprep.subr.mxu0 %v2063_v0  ;;  %1919 = vmatprep.subr.mxu1 %v2063_v0  ;;  %v1396_v62 = vld [vmem:[%s2727_s3 + $0xc8] sm:$0xff]  ;;  %v1395_v1 = vld [vmem:[%s2727_s3 + $0xc0] sm:$0xff]  ;;  %v1394_v3 = vld [vmem:[%s2727_s3 + $0xb8] sm:$0xff] }
  0x40   :  { %1596 = vmatpush3.msra.mxu0 %v226_v13  ;;  %1927 = vmatpush3.msra.mxu1 %v226_v13  ;;  %v650_v63 = vld [vmem:[%s2727_s3 + $0x48] sm:$0xff]  ;;  %v649_v2 = vld [vmem:[%s2727_s3 + $0x40] sm:$0xff]  ;;  %v648_v4 = vld [vmem:[%s2727_s3 + $0x38] sm:$0xff] }
  0x41   :  { %1597 = vmatprep.subr.mxu0 %v2063_v0  ;;  %1920 = vmatprep.subr.mxu1 %v2063_v0  ;;  %v1393_v5 = vld [vmem:[%s2727_s3 + $0xb0] sm:$0xff]  ;;  %v1391_v9 = vld [vmem:[%s2727_s3 + $0xa0] sm:$0xff]  ;;  %v1390_v11 = vld [vmem:[%s2727_s3 + $0x98] sm:$0xff] }
  0x42   :  { %1598 = vmatpush3.msra.mxu0 %v225_v14  ;;  %1928 = vmatpush3.msra.mxu1 %v225_v14  ;;  %v645_v10 = vld [vmem:[%s2727_s3 + $0x20] sm:$0xff]  ;;  %v644_v12 = vld [vmem:[%s2727_s3 + $0x18] sm:$0xff]  ;;  %v1389_v13 = vld [vmem:[%s2727_s3 + $0x90] sm:$0xff] }
  0x43   :  { %1600 = vmatmul.mubr.msk.f32.vlgmr.msra.gmra.mxu0 %vm2734_vm2, %v211_v16  ;;  %1612 = vmatmul.mubr.msk.f32.vlgmr.msra.gmra.mxu1 %vm2734_vm2, %v209_v17  ;;  %v643_v14 = vld [vmem:[%s2727_s3 + $0x10] sm:$0xff]  ;;  %v642_v16 = vld [vmem:[%s2727_s3 + $0x8] sm:$0xff]  ;;  %v1387_v17 = vld [vmem:[%s2727_s3 + $0x80] sm:$0xff] }
  0x44   :  { %1614 = vmatprep.subr.mxu1 %v2063_v0  ;;  %1645 = vmatprep.subr.mxu0 %v2063_v0 }
  0x45   :  { %1615 = vmatpush3.msra.mxu1 %v354_v18  ;;  %1646 = vmatpush3.msra.mxu0 %v468_v19  ;;  %v641_v18 = vld [vmem:[%s2727_s3] sm:$0xff]  ;;  %v93_v19 = vlaneseq }
  0x46   :  { %1616 = vmatprep.subr.mxu1 %v2063_v0  ;;  %1647 = vmatprep.subr.mxu0 %v2063_v0 }
  0x47   :  { %1602 = vmatprep.mubr.msk.f32.mxu0 %vm2064_vm0, %v2063_v0  ;;  %1617 = vmatpush3.msra.mxu1 %v353_v21  ;;  %v94_v20 = vshrl.u32 %v93_v19, 7 }
  0x48   :  { %1648 = vmatpush3.msra.mxu0 %v467_v23  ;;  %1618 = vmatprep.subr.mxu1 %v2063_v0 }
  0x49   :  { %1603 = vmatmul.mubr.msk.f32.gmra.mxu0 %vm2734_vm2, %v203_v24  ;;  %1649 = vmatprep.subr.mxu0 %v2063_v0  ;;  %v95_v23 = vadd.s32 8, %v94_v20  ;;  %v98_v37 = vadd.s32 32, %v94_v20 }
  0x4a   :  { %1619 = vmatpush3.msra.mxu1 %v352_v25  ;;  %1650 = vmatpush3.msra.mxu0 %v466_v26  ;;  %v96_v26 = vadd.s32 16, %v94_v20 }
  0x4b   :  { %1620 = vmatprep.subr.mxu1 %v2063_v0  ;;  %1651 = vmatprep.subr.mxu0 %v2063_v0  ;;  %v2393_v24 = vmul.u32.u64.low 3817748708, %v95_v23  ;;  %v2394_v25 = vmul.u32.u64.high 3817748708, %v95_v23, %v2393_v24 }
  0x4c   :  { %1605 = vmatprep.mubr.msk.f32.mxu0 %vm2064_vm0, %v2063_v0  ;;  %1621 = vmatpush3.msra.mxu1 %v351_v28 }
  0x4d   :  { %1652 = vmatpush3.msra.mxu0 %v465_v29  ;;  %1622 = vmatprep.subr.mxu1 %v2063_v0  ;;  %v97_v29 = vadd.s32 24, %v94_v20 }
  0x4e   :  { %1606 = vmatmul.mubr.msk.f32.gmra.mxu0 %vm2734_vm2, %v205_v30  ;;  %1653 = vmatprep.subr.mxu0 %v2063_v0 }
  0x4f   :  { %1623 = vmatpush3.msra.mxu1 %v350_v31  ;;  %1654 = vmatpush3.msra.mxu0 %v464_v32 }
  0x50   :  { %1624 = vmatprep.subr.mxu1 %v2063_v0  ;;  %1655 = vmatprep.subr.mxu0 %v2063_v0 }
  0x51   :  { %1608 = vmatprep.mubr.msk.f32.mxu0 %vm2064_vm0, %v2063_v0  ;;  %1625 = vmatpush3.msra.mxu1 %v349_v33 }
  0x52   :  { %1656 = vmatpush3.msra.mxu0 %v463_v34  ;;  %1626 = vmatprep.subr.mxu1 %v2063_v0  ;;  %v2399_v33 = vmul.u32.u64.low 3817748708, %v96_v26  ;;  %v2400_v34 = vmul.u32.u64.high 3817748708, %v96_v26, %v2399_v33 }
  0x53   :  { %1609 = vmatmul.mubr.msk.f32.gmra.mxu0 %vm2734_vm2, %v207_v35  ;;  %1657 = vmatprep.subr.mxu0 %v2063_v0  ;;  %v2402_v35 = vmul.u32.u64.low 3817748708, %v97_v29  ;;  %v2403_v36 = vmul.u32.u64.high 3817748708, %v97_v29, %v2402_v35 }
  0x54   :  { %1627 = vmatpush3.msra.mxu1 %v348_v38  ;;  %1658 = vmatpush3.msra.mxu0 %v462_v39 }
  0x55   :  { %1628 = vmatprep.subr.mxu1 %v2063_v0  ;;  %1659 = vmatprep.subr.mxu0 %v2063_v0 }
  0x56   :  { %1629 = vmatpush3.msra.mxu1 %v347_v40  ;;  %1630 = vmatprep.mubr.msk.f32.mxu1 %vm2064_vm0, %v2063_v0  ;;  %v116_v40 = vshrl.u32 %v2394_v25, 4 }
  0x57   :  { %1660 = vmatpush3.msra.mxu0 %v461_v41  ;;  %1661 = vmatprep.mubr.msk.f32.mxu0 %vm2064_vm0, %v2063_v0 }
  0x58   :  { %1631 = vmatmul.mubr.msk.f32.vlgmr.msra.gmra.mxu1 %vm2734_vm2, %v2153_v6  ;;  %1662 = vmatmul.mubr.msk.f32.vlgmr.msra.gmra.mxu0 %vm2734_vm2, %v215_v42  ;;  %v647_v6 = vld [vmem:[%s2727_s3 + $0x30] sm:$0xff]  ;;  %v2406_v42 = vmul.u32.u64.low 3817748708, %v98_v37  ;;  %v2407_v43 = vmul.u32.u64.high 3817748708, %v98_v37, %v2406_v42 }
  0x59   :  { %1633 = vmatprep.mubr.msk.f32.mxu1 %vm2064_vm0, %v2063_v0  ;;  %1664 = vmatprep.mubr.msk.f32.mxu0 %vm2064_vm0, %v2063_v0 }
  0x5a   :  { %1723 = vmatprep.subr.mxu0 %v2063_v0  ;;  %1676 = vmatprep.subr.mxu1 %v2063_v0 }
  0x5b   :  { %1724 = vmatpush3.msra.mxu0 %v1402_v44  ;;  %1677 = vmatpush3.msra.mxu1 %v656_v45  ;;  %v117_v45 = vmul.u32 18, %v116_v40 }
  0x5c   :  { %1634 = vmatmul.mubr.msk.f32.gmra.mxu1 %vm2734_vm2, %v2168_v15  ;;  %1665 = vmatmul.mubr.msk.f32.gmra.mxu0 %vm2734_vm2, %v217_v46  ;;  %v1388_v15 = vld [vmem:[%s2727_s3 + $0x88] sm:$0xff]  ;;  %v127_v46 = vshrl.u32 %v2400_v34, 4 }
  0x5d   :  { %1636 = vmatprep.mubr.msk.f32.mxu1 %vm2064_vm0, %v2063_v0  ;;  %1667 = vmatprep.mubr.msk.f32.mxu0 %vm2064_vm0, %v2063_v0 }
  0x5e   :  { %1725 = vmatprep.subr.mxu0 %v2063_v0  ;;  %1678 = vmatprep.subr.mxu1 %v2063_v0  ;;  %v128_v51 = vmul.u32 18, %v127_v46 }
  0x5f   :  { %1726 = vmatpush3.msra.mxu0 %v1401_v48  ;;  %1679 = vmatpush3.msra.mxu1 %v655_v49  ;;  %v138_v49 = vshrl.u32 %v2403_v36, 4 }
  0x60   :  { %1637 = vmatmul.mubr.msk.f32.gmra.mxu1 %vm2734_vm2, %v2181_v22  ;;  %1668 = vmatmul.mubr.msk.f32.gmra.mxu0 %vm2734_vm2, %v219_v50  ;;  %v2390_v21 = vmul.u32.u64.low 3817748708, %v94_v20  ;;  %v2391_v22 = vmul.u32.u64.high 3817748708, %v94_v20, %v2390_v21  ;;  %v118_v50 = vsub.s32 %v95_v23, %v117_v45  ;;  %v1162_v45 = vld [vmem:[%s2731_s7 + $0x38] sm:$0xff] }
  0x61   :  { %1639 = vmatprep.mubr.msk.f32.mxu1 %vm2064_vm0, %v2063_v0  ;;  %1670 = vmatprep.mubr.msk.f32.mxu0 %vm2064_vm0, %v2063_v0 }
  0x62   :  { %1727 = vmatprep.subr.mxu0 %v2063_v0  ;;  %1680 = vmatprep.subr.mxu1 %v2063_v0  ;;  %v105_v32 = vshrl.u32 %v2391_v22, 4  ;;  %vm155_vm8 = vcmp.ne.s32.totalorder %v118_v50, 0  ;;  %vm160_vm9 = vcmp.lt.s32.totalorder %v118_v50, 0 }
  0x63   :  { %1728 = vmatpush3.msra.mxu0 %v1400_v52  ;;  %1681 = vmatpush3.msra.mxu1 %v654_v53  ;;  %vm165_vm10 = vmand %vm160_vm9, %vm155_vm8 }
  0x64   :  { %1640 = vmatmul.mubr.msk.f32.gmra.mxu1 %vm2734_vm2, %v2155_v7  ;;  %1671 = vmatmul.mubr.msk.f32.gmra.mxu0 %vm2734_vm2, %v221_v54  ;;  %v1392_v7 = vld [vmem:[%s2727_s3 + $0xa8] sm:$0xff]  ;;  %v106_v39 = vmul.u32 18, %v105_v32  ;;  %v2416_v54 = vld [vmem:[%s2726_s2] ss:$0 sm:$0xff] }
  0x65   :  { %1642 = vmatprep.mubr.msk.f32.mxu1 %vm2064_vm0, %v2063_v0  ;;  %1673 = vmatprep.mubr.msk.f32.mxu0 %vm2064_vm0, %v2063_v0 }
  0x66   :  { %1729 = vmatprep.subr.mxu0 %v2063_v0  ;;  %1682 = vmatprep.subr.mxu1 %v2063_v0  ;;  %v107_v44 = vsub.s32 %v94_v20, %v106_v39  ;;  %v1414_v20 = vld [vmem:[%s2727_s3 + $0x130] sm:$0xff] }
  0x67   :  { %1730 = vmatpush3.msra.mxu0 %v1399_v55  ;;  %1683 = vmatpush3.msra.mxu1 %v653_v57  ;;  %v139_v55 = vmul.u32 18, %v138_v49 }
  0x68   :  { %1643 = vmatmul.mubr.msk.f32.gmra.mxu1 %vm2734_vm2, %v2157_v8  ;;  %1674 = vmatmul.mubr.msk.f32.gmra.mxu0 %vm2734_vm2, %v224_v56  ;;  %v646_v8 = vld [vmem:[%s2727_s3 + $0x28] sm:$0xff]  ;;  %vm154_vm5 = vcmp.ne.s32.totalorder %v107_v44, 0  ;;  %vm159_vm6 = vcmp.lt.s32.totalorder %v107_v44, 0  ;;  %v169_v53 = vadd.s32 18, %v107_v44  ;;  %v149_v56 = vshrl.u32 %v2407_v43, 4 }
  0x69   :  { %1731 = vmatprep.subr.mxu0 %v2063_v0  ;;  %1755 = vmatprep.mubr.msk.f32.mxu0 %vm2064_vm0, %v2063_v0  ;;  %vm164_vm7 = vmand %vm159_vm6, %vm154_vm5 }
  0x6a   :  { %1708 = vmatprep.mubr.msk.f32.mxu1 %vm2064_vm0, %v2063_v0  ;;  %1732 = vmatpush3.msra.mxu0 %v1398_v58  ;;  %v129_v58 = vsub.s32 %v96_v26, %v128_v51 }
  0x6b   :  { %1684 = vmatprep.subr.mxu1 %v2063_v0  ;;  %1733 = vmatprep.subr.mxu0 %v2063_v0 }
  0x6c   :  { %1685 = vmatpush3.msra.mxu1 %v652_v59  ;;  %1734 = vmatpush3.msra.mxu0 %v1397_v60  ;;  %v174_v60 = vsel %vm164_vm7, %v169_v53, %v107_v44  ;;  %vm156_vm11 = vcmp.ne.s32.totalorder %v129_v58, 0  ;;  %vm161_vm12 = vcmp.lt.s32.totalorder %v129_v58, 0 }
  0x6d   :  { %1686 = vmatprep.subr.mxu1 %v2063_v0  ;;  %1735 = vmatprep.subr.mxu0 %v2063_v0  ;;  %vm179_vm13 = vcmp.ge.s32.totalorder %v174_v60, 1  ;;  %vm184_vm14 = vcmp.le.s32.totalorder %v174_v60, 16  ;;  %vm166_vm15 = vmand %vm161_vm12, %vm156_vm11  ;;  %v1420_v60 = vld [vmem:[%s2727_s3 + $0x160] sm:$0xff] }
  0x6e   :  { %1687 = vmatpush3.msra.mxu1 %v651_v61  ;;  %1736 = vmatpush3.msra.mxu0 %v1396_v62  ;;  %v170_v61 = vadd.s32 18, %v118_v50  ;;  %vm2423_vm6 = vmand %vm179_vm13, %vm184_vm14 }
  0x6f   :  { %1688 = vmatprep.subr.mxu1 %v2063_v0  ;;  %1737 = vmatprep.subr.mxu0 %v2063_v0 }
  0x70   :  { %1689 = vmatpush3.msra.mxu1 %v650_v63  ;;  %1738 = vmatpush3.msra.mxu0 %v1395_v1  ;;  %v140_v1 = vsub.s32 %v97_v29, %v139_v55 }
  0x71   :  { %1690 = vmatprep.subr.mxu1 %v2063_v0  ;;  %1739 = vmatprep.subr.mxu0 %v2063_v0 }
  0x72   :  { %1691 = vmatpush3.msra.mxu1 %v649_v2  ;;  %1740 = vmatpush3.msra.mxu0 %v1394_v3  ;;  %v150_v2 = vmul.u32 18, %v149_v56  ;;  %vm157_vm5 = vcmp.ne.s32.totalorder %v140_v1, 0  ;;  %vm162_vm8 = vcmp.lt.s32.totalorder %v140_v1, 0  ;;  %v172_v22 = vadd.s32 18, %v140_v1 }
  0x73   :  { %1692 = vmatprep.subr.mxu1 %v2063_v0  ;;  %1741 = vmatprep.subr.mxu0 %v2063_v0  ;;  %vm2441_vm11 = vmand %vm162_vm8, %vm157_vm5 }
  0x74   :  { %1693 = vmatpush3.msra.mxu1 %v648_v4  ;;  %1742 = vmatpush3.msra.mxu0 %v1393_v5  ;;  %v177_v39 = vsel %vm2441_vm11, %v172_v22, %v140_v1  ;;  %v1412_v22 = vld [vmem:[%s2727_s3 + $0x120] sm:$0xff] }
  0x75   :  { %1694 = vmatprep.subr.mxu1 %v2063_v0  ;;  %1743 = vmatprep.subr.mxu0 %v2063_v0 }
  0x76   :  { %1695 = vmatpush3.msra.mxu1 %v647_v6  ;;  %1744 = vmatpush3.msra.mxu0 %v1392_v7 }
  0x77   :  { %1696 = vmatprep.subr.mxu1 %v2063_v0  ;;  %1745 = vmatprep.subr.mxu0 %v2063_v0 }
  0x78   :  { %1697 = vmatpush3.msra.mxu1 %v646_v8  ;;  %1746 = vmatpush3.msra.mxu0 %v1391_v9  ;;  %v175_v8 = vsel %vm165_vm10, %v170_v61, %v118_v50  ;;  %v171_v9 = vadd.s32 18, %v129_v58  ;;  %vm2428_vm10 = vmneg %vm200_vm1 }
  0x79   :  { %1698 = vmatprep.subr.mxu1 %v2063_v0  ;;  %1747 = vmatprep.subr.mxu0 %v2063_v0  ;;  %vm180_vm9 = vcmp.ge.s32.totalorder %v175_v8, 1  ;;  %vm185_vm2 = vcmp.le.s32.totalorder %v175_v8, 16 }
  0x7a   :  { %1699 = vmatpush3.msra.mxu1 %v645_v10  ;;  %1748 = vmatpush3.msra.mxu0 %v1390_v11  ;;  %v176_v21 = vsel %vm166_vm15, %v171_v9, %v129_v58  ;;  %vm2454_vm14 = vmand %vm180_vm9, %vm185_vm2  ;;  %vm182_vm9 = vcmp.ge.s32.totalorder %v177_v39, 1  ;;  %v1418_v9 = vld [vmem:[%s2727_s3 + $0x150] sm:$0xff] }
  0x7b   :  { %1700 = vmatprep.subr.mxu1 %v2063_v0  ;;  %1749 = vmatprep.subr.mxu0 %v2063_v0  ;;  %vm181_vm5 = vcmp.ge.s32.totalorder %v176_v21, 1 }
  0x7c   :  { %1701 = vmatpush3.msra.mxu1 %v644_v12  ;;  %1750 = vmatpush3.msra.mxu0 %v1389_v13  ;;  %v2421_v12 = vsub.s32 %v98_v37, %v150_v2  ;;  %v1419_v2 = vld [vmem:[%s2727_s3 + $0x158] sm:$0xff] }
  0x7d   :  { %1702 = vmatprep.subr.mxu1 %v2063_v0  ;;  %1751 = vmatprep.subr.mxu0 %v2063_v0 }
  0x7e   :  { %1703 = vmatpush3.msra.mxu1 %v643_v14  ;;  %1752 = vmatpush3.msra.mxu0 %v1388_v15  ;;  %vm158_vm12 = vcmp.ne.s32.totalorder %v2421_v12, 0  ;;  %vm163_vm15 = vcmp.lt.s32.totalorder %v2421_v12, 0  ;;  %v173_v40 = vadd.s32 18, %v2421_v12 }
  0x7f   :  { %1704 = vmatprep.subr.mxu1 %v2063_v0  ;;  %1753 = vmatprep.subr.mxu0 %v2063_v0  ;;  %vm2479_vm2 = vmand %vm163_vm15, %vm158_vm12 }
  0x80   :  { %1705 = vmatpush3.msra.mxu1 %v642_v16  ;;  %1754 = vmatpush3.msra.mxu0 %v1387_v17 }
  0x81   :  { %1706 = vmatprep.subr.mxu1 %v2063_v0 }
  0x82   :  { %1707 = vmatpush3.msra.mxu1 %v641_v18 }
  0x83   :  { %1770 = vmatprep.subr.mxu1 %v2063_v0 }
 0x103   :  { %v311_v27 = vpop.f32.mrf.mxu0  ;;  %v2396_v28 = vpop.f32.mrf.mxu1 }
 0x104   :  { %v341_v59 = vadd.f32 %v2416_v54, %v311_v27  ;;  %v345_v53 = vadd.f32 %v2416_v54, %v2396_v28 }
 0x105   :  { %v1601_v30 = vpop.f32.mrf.mxu0  ;;  %v1613_v31 = vpop.f32.mrf.mxu1 }
 0x106   :  { %v1423_v31 = vld [vmem:[%s2727_s3 + $0x178] sm:$0xff] }
 0x109   :  { %v316_v38 = vpop.f32.mrf.mxu0 }
 0x10a   :  { %v342_v6 = vadd.f32 %v2416_v54, %v316_v38  ;;  %v1422_v38 = vld [vmem:[%s2727_s3 + $0x170] sm:$0xff] }
 0x10b   :  { %v1604_v41 = vpop.f32.mrf.mxu0 }
 0x10e   :  { %v321_v47 = vpop.f32.mrf.mxu0 }
 0x10f   :  { %v343_v23 = vadd.f32 %v2416_v54, %v321_v47 }
 0x110   :  { %v1607_v48 = vpop.f32.mrf.mxu0 }
 0x111   :  { %v1421_v48 = vld [vmem:[%s2727_s3 + $0x168] sm:$0xff] }
 0x113   :  { %v2411_v52 = vpop.f32.mrf.mxu0 }
 0x114   :  { %v344_v36 = vadd.f32 %v2416_v54, %v2411_v52 }
 0x115   :  { %v1610_v57 = vpop.f32.mrf.mxu0 }
 0x116   :  { %v178_v57 = vsel %vm2479_vm2, %v173_v40, %v2421_v12  ;;  %v1417_v12 = vld [vmem:[%s2727_s3 + $0x148] sm:$0xff]  ;;  %v1167_v40 = vld [vmem:[%s2731_s7 + $0x60] sm:$0xff] }
 0x118   :  { %v431_v62 = vpop.f32.mrf.mxu1  ;;  %v546_v63 = vpop.f32.mrf.mxu0 }
 0x119   :  { %v455_v3 = vadd.f32 %v431_v62, %v341_v59 }
 0x11a   :  { %v1632_v4 = vpop.f32.mrf.mxu1  ;;  %v1663_v5 = vpop.f32.mrf.mxu0 }
 0x11b   :  { %v570_v7 = vadd.f32 %v546_v63, %v455_v3 }
 0x11c   :  { %v436_v10 = vpop.f32.mrf.mxu1  ;;  %v551_v11 = vpop.f32.mrf.mxu0 }
 0x11d   :  { %vm575_vm7 = vcmp.gt.f32.partialorder %v570_v7, 0.0  ;;  %v580_v14 = vmul.f32 0.2, %v570_v7  ;;  %v456_v15 = vadd.f32 %v436_v10, %v342_v6 }
 0x11e   :  { %v1635_v16 = vpop.f32.mrf.mxu1  ;;  %v1666_v17 = vpop.f32.mrf.mxu0 }
 0x11f   :  { %v585_v18 = vsel %vm575_vm7, %v570_v7, %v580_v14  ;;  %v571_v19 = vadd.f32 %v551_v11, %v456_v15  ;;  %v1416_v16 = vld [vmem:[%s2727_s3 + $0x140] sm:$0xff] }
 0x120   :  { %v2435_v24 = vsel %vm2423_vm6, %v585_v18, 0.0  ;;  %v441_v25 = vpop.f32.mrf.mxu1  ;;  %1756 = vmatmul.mubr.msk.f32.vlgmr.msra.gmra.mxu0 %vm2423_vm6, %v585_v18  ;;  %v556_v26 = vpop.f32.mrf.mxu0  ;;  %vm186_vm6 = vcmp.le.s32.totalorder %v176_v21, 16  ;;  %v1415_v18 = vld [vmem:[%s2727_s3 + $0x138] sm:$0xff]  ;;  %v1413_v21 = vld [vmem:[%s2727_s3 + $0x128] sm:$0xff] }
 0x121   :  { %v611_v29 = vrot.slane %v2435_v24, 7  ;;  %vm576_vm13 = vcmp.gt.f32.partialorder %v571_v19, 0.0  ;;  %v581_v30 = vmul.f32 0.2, %v571_v19  ;;  %1758 = vmatprep.mubr.msk.f32.mxu0 %vm2064_vm0, %v2063_v0  ;;  %v457_v33 = vadd.f32 %v441_v25, %v343_v23  ;;  %vm2494_vm8 = vmand %vm181_vm5, %vm186_vm6  ;;  %v1411_v23 = vld [vmem:[%s2727_s3 + $0x118] sm:$0xff]  ;;  %v1410_v25 = vld [vmem:[%s2727_s3 + $0x110] sm:$0xff] }
 0x122   :  { %v1638_v34 = vpop.f32.mrf.mxu1  ;;  %v1669_v35 = vpop.f32.mrf.mxu0  ;;  %vm2749_vm6 = vcmask 523264  }
 0x123   :  { %1709 = vmatmul.mubr.msk.f32.vlgmr.msra.gmra.mxu1 %vm2428_vm10, %v611_v29  ;;  %v586_v37 = vsel %vm576_vm13, %v571_v19, %v581_v30  ;;  %v572_v41 = vadd.f32 %v556_v26, %v457_v33  ;;  %vm187_vm10 = vcmp.le.s32.totalorder %v177_v39, 16  ;;  %vm183_vm13 = vcmp.ge.s32.totalorder %v178_v57, 1  ;;  %v1409_v26 = vld [vmem:[%s2727_s3 + $0x108] sm:$0xff]  ;;  %v1169_v39 = vld [vmem:[%s2731_s7 + $0x70] sm:$0xff] }
 0x124   :  { %1771 = vmatpush3.msra.mxu1 %v1423_v31  ;;  %v446_v42 = vpop.f32.mrf.mxu1  ;;  %v2471_v43 = vsel %vm2454_vm14, %v586_v37, 0.0  ;;  %1759 = vmatmul.mubr.msk.f32.gmra.mxu0 %vm2454_vm14, %v586_v37  ;;  %v561_v44 = vpop.f32.mrf.mxu0  ;;  %vm2517_vm12 = vmand %vm182_vm9, %vm187_vm10  ;;  %vm188_vm14 = vcmp.le.s32.totalorder %v178_v57, 16  ;;  %v626_v30 = vrot.slane %v2435_v24, 1  ;;  %v982_v37 = vld [vmem:[#allocation7] sm:$0xff] }
 0x125   :  { %v458_v46 = vadd.f32 %v446_v42, %v344_v36  ;;  %v612_v47 = vrot.slane %v2471_v43, 7  ;;  %1772 = vmatprep.subr.mxu1 %v2063_v0  ;;  %1711 = vmatprep.mubr.msk.f32.mxu1 %vm2064_vm0, %v2063_v0  ;;  %vm577_vm7 = vcmp.gt.f32.partialorder %v572_v41, 0.0  ;;  %v582_v49 = vmul.f32 0.2, %v572_v41  ;;  %vm193_vm5 = vmand %vm183_vm13, %vm188_vm14  ;;  %v1165_v42 = vld [vmem:[%s2731_s7 + $0x50] sm:$0xff] }
 0x126   :  { %1773 = vmatpush3.msra.mxu1 %v1422_v38  ;;  %v1641_v50 = vpop.f32.mrf.mxu1  ;;  %1761 = vmatprep.mubr.msk.f32.mxu0 %vm2064_vm0, %v2063_v0  ;;  %v1672_v51 = vpop.f32.mrf.mxu0  ;;  %v627_v27 = vrot.slane %v2471_v43, 1  ;;  %v1170_v38 = vld [vmem:[%s2731_s7 + $0x78] sm:$0xff]  ;;  %v1164_v43 = vld [vmem:[%s2731_s7 + $0x48] sm:$0xff] }
 0x127   :  { %v573_v55 = vadd.f32 %v561_v44, %v458_v46  ;;  %1774 = vmatprep.subr.mxu1 %v2063_v0  ;;  %v613_v56 = vsel %vm200_vm1, %v611_v29, %v612_v47  ;;  %v587_v59 = vsel %vm577_vm7, %v572_v41, %v582_v49  ;;  %v1408_v29 = vld [vmem:[%s2727_s3 + $0x100] sm:$0xff]  ;;  %v1166_v41 = vld [vmem:[%s2731_s7 + $0x58] sm:$0xff]  ;;  %v1161_v46 = vld [vmem:[%s2731_s7 + $0x30] sm:$0xff] }
 0x128   :  { %1775 = vmatpush3.msra.mxu1 %v1421_v48  ;;  %v451_v58 = vpop.f32.mrf.mxu1  ;;  %v566_v61 = vpop.f32.mrf.mxu0  ;;  %v2511_v62 = vsel %vm2494_vm8, %v587_v59, 0.0  ;;  %1762 = vmatmul.mubr.msk.f32.gmra.mxu0 %vm2494_vm8, %v587_v59  ;;  %v628_v32 = vsel %vm212_vm3, %v626_v30, %v627_v27  ;;  %v1163_v44 = vld [vmem:[%s2731_s7 + $0x40] sm:$0xff] }
 0x129   :  { %vm578_vm11 = vcmp.gt.f32.partialorder %v573_v55, 0.0  ;;  %v583_v28 = vmul.f32 0.2, %v573_v55  ;;  %v459_v54 = vadd.f32 %v451_v58, %v345_v53  ;;  %1712 = vmatmul.mubr.f32.gmra.mxu1 %v613_v56  ;;  %v614_v1 = vrot.slane %v2511_v62, 7  ;;  %1776 = vmatprep.subr.mxu1 %v2063_v0 }
 0x12a   :  { %1714 = vmatprep.mubr.msk.f32.mxu1 %vm2064_vm0, %v2063_v0  ;;  %v1644_v3 = vpop.f32.mrf.mxu1  ;;  %v1675_v4 = vpop.f32.mrf.mxu0  ;;  %1777 = vmatpush3.msra.mxu1 %v1420_v60  ;;  %v629_v31 = vrot.slane %v2511_v62, 1 }
 0x12b   :  { %v574_v5 = vadd.f32 %v566_v61, %v459_v54  ;;  %1764 = vmatprep.mubr.msk.f32.mxu0 %vm2064_vm0, %v2063_v0  ;;  %v588_v6 = vsel %vm578_vm11, %v573_v55, %v583_v28  ;;  %1778 = vmatprep.subr.mxu1 %v2063_v0  ;;  %v615_v7 = vsel %vm200_vm1, %v612_v47, %v614_v1  ;;  %v1160_v47 = vld [vmem:[%s2731_s7 + $0x28] sm:$0xff] }
 0x12c   :  { %v2535_v8 = vsel %vm2517_vm12, %v588_v6, 0.0  ;;  %1779 = vmatpush3.msra.mxu1 %v1419_v2  ;;  %1765 = vmatmul.mubr.msk.f32.gmra.mxu0 %vm2517_vm12, %v588_v6  ;;  %v630_v34 = vsel %vm212_vm3, %v627_v27, %v629_v31 }
 0x12d   :  { %vm579_vm15 = vcmp.gt.f32.partialorder %v574_v5, 0.0  ;;  %v584_v10 = vmul.f32 0.2, %v574_v5  ;;  %v616_v11 = vrot.slane %v2535_v8, 7  ;;  %1715 = vmatmul.mubr.f32.gmra.mxu1 %v615_v7  ;;  %1780 = vmatprep.subr.mxu1 %v2063_v0  ;;  %v631_v33 = vrot.slane %v2535_v8, 1 }
 0x12e   :  { %1781 = vmatpush3.msra.mxu1 %v1418_v9  ;;  %1717 = vmatprep.mubr.msk.f32.mxu1 %vm2064_vm0, %v2063_v0  ;;  %v1386_v9 = vld [vmem:[%s2728_s4] ss:$0 sm:$0xff] }
 0x12f   :  { %v617_v13 = vsel %vm200_vm1, %v614_v1, %v616_v11  ;;  %v589_v14 = vsel %vm579_vm15, %v574_v5, %v584_v10  ;;  %1782 = vmatprep.subr.mxu1 %v2063_v0  ;;  %1767 = vmatprep.mubr.msk.f32.mxu0 %vm2064_vm0, %v2063_v0  ;;  %v632_v35 = vsel %vm212_vm3, %v629_v31, %v631_v33 }
 0x130   :  { %v604_v15 = vsel %vm193_vm5, %v589_v14, 0.0  ;;  %1783 = vmatpush3.msra.mxu1 %v1417_v12  ;;  %1768 = vmatmul.mubr.msk.f32.gmra.mxu0 %vm193_vm5, %v589_v14 }
 0x131   :  { %v618_v17 = vrot.slane %v604_v15, 7  ;;  %1718 = vmatmul.mubr.f32.gmra.mxu1 %v617_v13  ;;  %1784 = vmatprep.subr.mxu1 %v2063_v0  ;;  %v633_v24 = vrot.slane %v604_v15, 1 }
 0x132   :  { %1785 = vmatpush3.msra.mxu1 %v1416_v16  ;;  %1720 = vmatprep.mubr.msk.f32.mxu1 %vm2064_vm0, %v2063_v0 }
 0x133   :  { %v619_v19 = vsel %vm200_vm1, %v616_v11, %v618_v17  ;;  %1786 = vmatprep.subr.mxu1 %v2063_v0  ;;  %v634_v36 = vsel %vm212_vm3, %v631_v33, %v633_v24  ;;  %vm984_vm1 = vcmask 293888   ;;  %v1070_v33 = vld [vmem:[#allocation8] sm:$0xff] }
 0x134   :  { %1787 = vmatpush3.msra.mxu1 %v1415_v18  ;;  %1827 = vmatprep.mubr.msk.f32.mxu0 %vm984_vm1, %v982_v37  ;;  %v1258_v37 = vld [vmem:[%s2732_s8 + $0x60] sm:$0xff] }
 0x135   :  { %1721 = vmatmul.mubr.f32.gmra.mxu1 %v619_v19  ;;  %1788 = vmatprep.subr.mxu1 %v2063_v0 }
 0x136   :  { %1789 = vmatpush3.msra.mxu1 %v1414_v20  ;;  %1802 = vmatprep.mubr.msk.f32.mxu1 %vm2064_vm0, %v2063_v0 }
 0x137   :  { %1790 = vmatprep.subr.mxu1 %v2063_v0 }
 0x138   :  { %1791 = vmatpush3.msra.mxu1 %v1413_v21 }
 0x139   :  { %1792 = vmatprep.subr.mxu1 %v2063_v0 }
 0x13a   :  { %1793 = vmatpush3.msra.mxu1 %v1412_v22 }
 0x13b   :  { %1794 = vmatprep.subr.mxu1 %v2063_v0 }
 0x13c   :  { %1795 = vmatpush3.msra.mxu1 %v1411_v23 }
 0x13d   :  { %1796 = vmatprep.subr.mxu1 %v2063_v0 }
 0x13e   :  { %1797 = vmatpush3.msra.mxu1 %v1410_v25 }
 0x13f   :  { %1798 = vmatprep.subr.mxu1 %v2063_v0 }
 0x140   :  { %1799 = vmatpush3.msra.mxu1 %v1409_v26 }
 0x141   :  { %1800 = vmatprep.subr.mxu1 %v2063_v0 }
 0x142   :  { %1801 = vmatpush3.msra.mxu1 %v1408_v29 }
 0x143   :  { %1803 = vmatmul.mubr.f32.vlgmr.msra.gmra.mxu1 %v628_v32  ;;  %1843 = vmatprep.subr.mxu1 %v1170_v38  ;;  %v983_v32 = vld [vmem:[#allocation7 + $0x8] sm:$0xff] }
 0x144   :  { %1805 = vmatprep.mubr.msk.f32.mxu1 %vm2064_vm0, %v2063_v0  ;;  %1844 = vmatpush3.msra.mxu1 %v1170_v38  ;;  %v1257_v38 = vld [vmem:[%s2732_s8 + $0x58] sm:$0xff] }
 0x145   :  { %1845 = vmatprep.subr.mxu1 %v1169_v39 }
 0x146   :  { %1846 = vmatpush3.msra.mxu1 %v1169_v39  ;;  %v1256_v39 = vld [vmem:[%s2732_s8 + $0x50] sm:$0xff] }
 0x147   :  { %1806 = vmatmul.mubr.f32.gmra.mxu1 %v630_v34  ;;  %v1071_v34 = vld [vmem:[#allocation8 + $0x8] sm:$0xff] }
 0x148   :  { %1808 = vmatprep.mubr.msk.f32.mxu1 %vm2064_vm0, %v2063_v0 }
 0x14b   :  { %1809 = vmatmul.mubr.f32.gmra.mxu1 %v632_v35  ;;  %v1260_v35 = vld [vmem:[%s2732_s8 + $0x70] sm:$0xff] }
 0x14c   :  { %1811 = vmatprep.mubr.msk.f32.mxu1 %vm2064_vm0, %v2063_v0 }
 0x14f   :  { %1812 = vmatmul.mubr.f32.gmra.mxu1 %v634_v36  ;;  %v1259_v36 = vld [vmem:[%s2732_s8 + $0x68] sm:$0xff] }
 0x150   :  { %1814 = vmatprep.mubr.msk.f32.mxu1 %vm2064_vm0, %v2063_v0  ;;  %v1168_v0 = vld [vmem:[%s2731_s7 + $0x68] sm:$0xff]  ;;  %vm991_vm0 = vcmask 1043456  }
 0x151   :  { %1847 = vmatprep.subr.mxu1 %v1168_v0 }
 0x152   :  { %1848 = vmatpush3.msra.mxu1 %v1168_v0  ;;  %v1255_v0 = vld [vmem:[%s2732_s8 + $0x48] sm:$0xff] }
 0x153   :  { %1815 = vmatmul.mubr.msk.f32.gmra.mxu1 %vm223_vm4, %v633_v24  ;;  %1849 = vmatprep.subr.mxu1 %v1167_v40  ;;  %v1261_v24 = vld [vmem:[%s2732_s8 + $0x78] sm:$0xff] }
 0x154   :  { %1850 = vmatpush3.msra.mxu1 %v1167_v40  ;;  %v1254_v40 = vld [vmem:[%s2732_s8 + $0x40] sm:$0xff] }
 0x155   :  { %1851 = vmatprep.subr.mxu1 %v1166_v41 }
 0x156   :  { %1852 = vmatpush3.msra.mxu1 %v1166_v41  ;;  %v1253_v41 = vld [vmem:[%s2732_s8 + $0x38] sm:$0xff] }
 0x157   :  { %1853 = vmatprep.subr.mxu1 %v1165_v42 }
 0x158   :  { %1854 = vmatpush3.msra.mxu1 %v1165_v42  ;;  %v1252_v42 = vld [vmem:[%s2732_s8 + $0x30] sm:$0xff] }
 0x159   :  { %1855 = vmatprep.subr.mxu1 %v1164_v43 }
 0x15a   :  { %1856 = vmatpush3.msra.mxu1 %v1164_v43  ;;  %v1251_v43 = vld [vmem:[%s2732_s8 + $0x28] sm:$0xff] }
 0x15b   :  { %1857 = vmatprep.subr.mxu1 %v1163_v44 }
 0x15c   :  { %1858 = vmatpush3.msra.mxu1 %v1163_v44  ;;  %v1159_v44 = vld [vmem:[%s2731_s7 + $0x20] sm:$0xff] }
 0x15d   :  { %1859 = vmatprep.subr.mxu1 %v1162_v45 }
 0x15e   :  { %1860 = vmatpush3.msra.mxu1 %v1162_v45  ;;  %v1250_v45 = vld [vmem:[%s2732_s8 + $0x20] sm:$0xff] }
 0x15f   :  { %1861 = vmatprep.subr.mxu1 %v1161_v46 }
 0x160   :  { %1862 = vmatpush3.msra.mxu1 %v1161_v46  ;;  %v1158_v46 = vld [vmem:[%s2731_s7 + $0x18] sm:$0xff] }
 0x161   :  { %1863 = vmatprep.subr.mxu1 %v1160_v47 }
 0x162   :  { %1864 = vmatpush3.msra.mxu1 %v1160_v47  ;;  %v1249_v47 = vld [vmem:[%s2732_s8 + $0x18] sm:$0xff] }
 0x163   :  { %1865 = vmatprep.subr.mxu1 %v1159_v44 }
 0x164   :  { %1866 = vmatpush3.msra.mxu1 %v1159_v44 }
 0x165   :  { %1867 = vmatprep.subr.mxu1 %v1158_v46 }
 0x166   :  { %1868 = vmatpush3.msra.mxu1 %v1158_v46 }
 0x1e0   :  { %v841_v48 = vpop.f32.mrf.mxu0 }
 0x1e2   :  { %v1757_v49 = vpop.f32.mrf.mxu0 }
 0x1e3   :  { %v723_v50 = vpop.f32.mrf.mxu1  ;;  %v1248_v49 = vld [vmem:[%s2732_s8 + $0x10] sm:$0xff] }
 0x1e4   :  { %v846_v51 = vpop.f32.mrf.mxu0  ;;  %v753_v22 = vadd.f32 %v1386_v9, %v723_v50  ;;  %v1156_v50 = vld [vmem:[%s2731_s7 + $0x8] sm:$0xff] }
 0x1e5   :  { %v1710_v52 = vpop.f32.mrf.mxu1 }
 0x1e6   :  { %v1760_v53 = vpop.f32.mrf.mxu0  ;;  %v865_v29 = vadd.f32 %v841_v48, %v753_v22  ;;  %v1157_v48 = vld [vmem:[%s2731_s7 + $0x10] sm:$0xff]  ;;  %v1155_v52 = vld [vmem:[%s2731_s7] sm:$0xff]  ;;  %s2065_s7 = smov 64  }
 0x1e7   :  { %1869 = vmatprep.subr.mxu1 %v1157_v48  ;;  %v1246_v53 = vld [vmem:[%s2732_s8] sm:$0xff] }
 0x1e8   :  { %v851_v56 = vpop.f32.mrf.mxu0  ;;  %1870 = vmatpush3.msra.mxu1 %v1157_v48 }
 0x1e9   :  { %v728_v55 = vpop.f32.mrf.mxu1  ;;  %1871 = vmatprep.subr.mxu1 %v1156_v50 }
 0x1ea   :  { %v1763_v58 = vpop.f32.mrf.mxu0  ;;  %v754_v18 = vadd.f32 %v1386_v9, %v728_v55  ;;  %1872 = vmatpush3.msra.mxu1 %v1156_v50 }
 0x1eb   :  { %v1713_v57 = vpop.f32.mrf.mxu1  ;;  %1873 = vmatprep.subr.mxu1 %v1155_v52 }
 0x1ec   :  { %v856_v59 = vpop.f32.mrf.mxu0  ;;  %v866_v26 = vadd.f32 %v846_v51, %v754_v18  ;;  %v1247_v51 = vld [vmem:[%s2732_s8 + $0x8] sm:$0xff]  ;;  %1874 = vmatpush3.msra.mxu1 %v1155_v52  ;;  %s2066_s8 = smov [#allocation10]  }
 0x1ed   :  { %v733_v60 = vpop.f32.mrf.mxu1  ;;  %s1357_s11 = sshll.u32 %s2066_s8, 4  ;;  %s1358_s11 = int_to_ptr.vmem [resolvable:$true] %s1357_s11 }
 0x1ee   :  { %v1766_v61 = vpop.f32.mrf.mxu0  ;;  %v755_v15 = vadd.f32 %v1386_v9, %v733_v60  ;;  %s2029_s12 = scalar_lea.vmem %s1358_s11, 128  ;;  %p2034_p7 = scmp.lt.s32.totalorder %s1358_s11, %s1358_s11 }
 0x1ef   :  { %v1716_v28 = vpop.f32.mrf.mxu1  ;;  %p2030_p6 = scmp.ne.s32.totalorder %s1358_s11, %s2029_s12  ;;  %p2035_p8 = scmp.lt.s32.totalorder %s2029_s12, %s2029_s12 }
 0x1f0   :  { %v861_v54 = vpop.f32.mrf.mxu0  ;;  %v867_v23 = vadd.f32 %v851_v56, %v755_v15 }
 0x1f1   :  { %v738_v62 = vpop.f32.mrf.mxu1  ;;  %p2036_p9 = por %p2035_p8, %p2034_p7 }
 0x1f2   :  { %v1769_v63 = vpop.f32.mrf.mxu0  ;;  %v756_v13 = vadd.f32 %v1386_v9, %v738_v62 }
 0x1f3   :  { %v1719_v1 = vpop.f32.mrf.mxu1  ;;  %p2037_p10 = pnand %p2036_p9, %p2030_p6 }
 0x1f4   :  { %v868_v19 = vadd.f32 %v856_v59, %v756_v13 }
 0x1f5   :  { %v743_v2 = vpop.f32.mrf.mxu1 }
 0x1f6   :  { %v757_v11 = vadd.f32 %v1386_v9, %v743_v2 }
 0x1f7   :  { %v1722_v3 = vpop.f32.mrf.mxu1 }
 0x1f8   :  { %v869_v16 = vadd.f32 %v861_v54, %v757_v11 }
 0x203   :  { %v953_v4 = vpop.f32.mrf.mxu1 }
 0x204   :  { %v977_v31 = vadd.f32 %v953_v4, %v865_v29 }
 0x205   :  { %v1804_v5 = vpop.f32.mrf.mxu1 }
 0x207   :  { %v958_v6 = vpop.f32.mrf.mxu1 }
 0x208   :  { %v978_v30 = vadd.f32 %v958_v6, %v866_v26 }
 0x209   :  { %v1807_v7 = vpop.f32.mrf.mxu1 }
 0x20b   :  { %v963_v8 = vpop.f32.mrf.mxu1 }
 0x20c   :  { %v979_v27 = vadd.f32 %v963_v8, %v867_v23 }
 0x20d   :  { %v1810_v10 = vpop.f32.mrf.mxu1 }
 0x20f   :  { %v968_v12 = vpop.f32.mrf.mxu1 }
 0x210   :  { %v980_v25 = vadd.f32 %v968_v12, %v868_v19 }
 0x211   :  { %v1813_v14 = vpop.f32.mrf.mxu1 }
 0x213   :  { %v973_v17 = vpop.f32.mrf.mxu1 }
 0x214   :  { %v981_v20 = vadd.f32 %v973_v17, %v869_v16 }
 0x215   :  { %v1816_v21 = vpop.f32.mrf.mxu1 }
 0x216   :  { %1817 = vmatprep.subr.msk.mxu0 %vm991_vm0, %v981_v20 }
 0x217   :  { %1818 = vmatpush3.msk.msra.mxu0 %vm991_vm0, %v981_v20 }
 0x218   :  { %1819 = vmatprep.subr.mxu0 %v980_v25 }
 0x219   :  { %1820 = vmatpush3.msra.mxu0 %v980_v25 }
 0x21a   :  { %1821 = vmatprep.subr.mxu0 %v979_v27 }
 0x21b   :  { %1822 = vmatpush3.msra.mxu0 %v979_v27 }
 0x21c   :  { %1823 = vmatprep.subr.mxu0 %v978_v30 }
 0x21d   :  { %1824 = vmatpush3.msra.mxu0 %v978_v30 }
 0x21e   :  { %1825 = vmatprep.subr.mxu0 %v977_v31 }
 0x21f   :  { %1826 = vmatpush3.msra.mxu0 %v977_v31 }
 0x220   :  { %1830 = vmatprep.subr.msk.mxu0 %vm991_vm0, %v981_v20  ;;  %1828 = vmatmul.mubr.msk.f32.vlgmr.msra.gmra.mxu0 %vm984_vm1, %v983_v32 }
 0x221   :  { %1831 = vmatpush3.msk.msra.mxu0 %vm991_vm0, %v981_v20  ;;  %1840 = vmatprep.mubr.msk.f32.mxu0 %vm984_vm1, %v1070_v33 }
 0x222   :  { %1832 = vmatprep.subr.mxu0 %v980_v25 }
 0x223   :  { %1833 = vmatpush3.msra.mxu0 %v980_v25 }
 0x224   :  { %1834 = vmatprep.subr.mxu0 %v979_v27 }
 0x225   :  { %1835 = vmatpush3.msra.mxu0 %v979_v27 }
 0x226   :  { %1836 = vmatprep.subr.mxu0 %v978_v30 }
 0x227   :  { %1837 = vmatpush3.msra.mxu0 %v978_v30 }
 0x228   :  { %1838 = vmatprep.subr.mxu0 %v977_v31 }
 0x229   :  { %1839 = vmatpush3.msra.mxu0 %v977_v31 }
 0x22a   :  { %1841 = vmatmul.mubr.msk.f32.vlgmr.msra.gmra.mxu0 %vm984_vm1, %v1071_v34  ;;  %1878 = vmatprep.subr.mxu0 %v1261_v24 }
 0x22b   :  { %1879 = vmatpush3.msra.mxu0 %v1261_v24 }
 0x22c   :  { %1880 = vmatprep.subr.mxu0 %v1260_v35 }
 0x22d   :  { %1881 = vmatpush3.msra.mxu0 %v1260_v35 }
 0x22e   :  { %1882 = vmatprep.subr.mxu0 %v1259_v36 }
 0x22f   :  { %1883 = vmatpush3.msra.mxu0 %v1259_v36 }
 0x230   :  { %1884 = vmatprep.subr.mxu0 %v1258_v37 }
 0x231   :  { %1885 = vmatpush3.msra.mxu0 %v1258_v37 }
 0x232   :  { %1886 = vmatprep.subr.mxu0 %v1257_v38 }
 0x233   :  { %1887 = vmatpush3.msra.mxu0 %v1257_v38 }
 0x234   :  { %1888 = vmatprep.subr.mxu0 %v1256_v39 }
 0x235   :  { %1889 = vmatpush3.msra.mxu0 %v1256_v39 }
 0x236   :  { %1890 = vmatprep.subr.mxu0 %v1255_v0 }
 0x237   :  { %1891 = vmatpush3.msra.mxu0 %v1255_v0 }
 0x238   :  { %1892 = vmatprep.subr.mxu0 %v1254_v40 }
 0x239   :  { %1893 = vmatpush3.msra.mxu0 %v1254_v40 }
 0x23a   :  { %1894 = vmatprep.subr.mxu0 %v1253_v41 }
 0x23b   :  { %1895 = vmatpush3.msra.mxu0 %v1253_v41 }
 0x23c   :  { %1896 = vmatprep.subr.mxu0 %v1252_v42 }
 0x23d   :  { %1897 = vmatpush3.msra.mxu0 %v1252_v42 }
 0x23e   :  { %1898 = vmatprep.subr.mxu0 %v1251_v43 }
 0x23f   :  { %1899 = vmatpush3.msra.mxu0 %v1251_v43 }
 0x240   :  { %1900 = vmatprep.subr.mxu0 %v1250_v45 }
 0x241   :  { %1901 = vmatpush3.msra.mxu0 %v1250_v45 }
 0x242   :  { %1902 = vmatprep.subr.mxu0 %v1249_v47 }
 0x243   :  { %1903 = vmatpush3.msra.mxu0 %v1249_v47 }
 0x244   :  { %1904 = vmatprep.subr.mxu0 %v1248_v49 }
 0x245   :  { %1905 = vmatpush3.msra.mxu0 %v1248_v49 }
 0x246   :  { %1906 = vmatprep.subr.mxu0 %v1247_v51 }
 0x247   :  { %1907 = vmatpush3.msra.mxu0 %v1247_v51 }
 0x248   :  { %1908 = vmatprep.subr.mxu0 %v1246_v53 }
 0x249   :  { %1909 = vmatpush3.msra.mxu0 %v1246_v53 }
 0x2e0   :  { %v1829_v55 = vpop.f32.mrf.mxu0 }
 0x2e2   :  { %v1061_v56 = vpop.f32.mrf.mxu0 }
 0x2ea   :  { %v1842_v57 = vpop.f32.mrf.mxu0 }
 0x2eb   :  { %v1154_v60 = vmax.f32 %v1829_v55, %v1842_v57 }
 0x2ec   :  { %v1144_v58 = vpop.f32.mrf.mxu0 }
 0x2ed   :  { %v1153_v59 = vmax.f32 %v1061_v56, %v1144_v58 }
 0x2ef   :  { %1875 = vmatprep.mubr.f32.mxu1 %v1153_v59  ;;  %1910 = vmatprep.mubr.f32.mxu0 %v1153_v59 }
 0x2f0   :  { %1876 = vmatmul.mubr.f32.vlgmr.msra.gmra.mxu1 %v1154_v60  ;;  %1911 = vmatmul.mubr.f32.vlgmr.msra.gmra.mxu0 %v1154_v60 }
 0x3b0   :  { %v1877_v61 = vpop.f32.mrf.mxu1  ;;  %v1912_v28 = vpop.f32.mrf.mxu0 }
 0x3b1   :  { %v1338_v54 = vmax.f32 %v1877_v61, %v1912_v28 }
 0x3b2   :  { %v1237_v1 = vpop.f32.mrf.mxu1  ;;  %v1328_v2 = vpop.f32.mrf.mxu0 }
 0x3b3   :  { %vm1340_vm3 = vcmp.gt.f32.partialorder %v1338_v54, 0.0  ;;  %v1342_v62 = vmul.f32 0.2, %v1338_v54  ;;  %v1337_v3 = vmax.f32 %v1237_v1, %v1328_v2 }
 0x3b5   :  { %v1344_v63 = vsel %vm1340_vm3, %v1338_v54, %v1342_v62  ;;  %v1341_v4 = vmul.f32 0.2, %v1337_v3  ;;  %vm1339_vm4 = vcmp.gt.f32.partialorder %v1337_v3, 0.0 }
 0x3b6   :  { %1346 = vrot.lane.b32.xlu0 %v1344_v63, %s2065_s7 }
 0x3b7   :  { %v1343_v5 = vsel %vm1339_vm4, %v1337_v3, %v1341_v4 }
 0x428   :  { %v1347_v6 = vpop.permute.xlu0 %1346 }
 0x429   :  { %v1349_v7 = vsel %vm2749_vm6, %v1343_v5, %v1347_v6 }
 0x42a   :  { %1350 = vst [vmem:[#allocation10] sm:$0xff] %v1349_v7 }
 0x42b   :  { %2040 = shalt.err (!%p2037_p10)
}
 0x42c   :  { %1360 = dma.vmem_to_hbm [thread:$0]  %s1358_s11, 128, %s2733_s9, [#allocation4]  }
 0x42d   :  { %2055 = dma.done.wait [#allocation4], 128  }
 0x42e   :  { %2056 = vsyncadd [#allocation4], 4294967168 }
 0x42f   :  { %1364 = vsyncpa [#allocation3], 1 }
 0x430   :  { %1365 = vsyncpa [#allocation6], 1 }
 0x431   :  { %1366 = vsyncpa [#allocation9], 1 }
 0x432   :  { %1367 = vsyncpa [#allocation4], 1 }

</bundles_post_ra>
